<compile_context>
chip_gen: v5e
topology: v5e:2x2
jax: 0.10.0
libtpu: 0.0.40
codegen_flags: <defaults>
</compile_context>

<pallas_src>
import functools

import jax
import jax.numpy as jnp
from jax import lax
from jax.experimental import pallas as pl
from jax.experimental.pallas import tpu as pltpu

MARGIN = 1.0
EPS = 1e-6
POISON = 1e30  # written into |y|^2 of padded columns so they never win the min


def _round_up(v, m):
    return (v + m - 1) // m * m


def _bhn_kernel(x_ref, y_ref, ap_ref, x2_ref, o_ref, minm_ref, *,
                margin, eps, tm, tn):
    i = pl.program_id(0)
    j = pl.program_id(1)
    n_col_blocks = pl.num_programs(1)

    # Single MXU matmul over the augmented feature dim (K = D + 1):
    #   m[r, c] = |y_c|^2 - 2 x_r . y_c    (padded cols arrive pre-poisoned)
    m = lax.dot_general(x_ref[...], y_ref[...],
                        (((1,), (1,)), ((), ())),
                        preferred_element_type=jnp.float32)        # (tm, tn)

    @pl.when(j == 0)
    def _init():
        minm_ref[...] = jnp.full_like(minm_ref, jnp.inf)

    row0 = i * tm
    col0 = j * tn
    n_slabs = tn // 128

    # Does this column block intersect this row block's diagonal entries?
    diag_here = jnp.logical_and(row0 < col0 + tn, col0 < row0 + tm)

    @pl.when(jnp.logical_not(diag_here))
    def _plain_min():
        # Pure VPU: elementwise mins into the (tm,128) lane-group accumulator.
        part = minm_ref[...]
        for s in range(n_slabs):
            part = jnp.minimum(part, m[:, s * 128:(s + 1) * 128])
        minm_ref[...] = part

    @pl.when(diag_here)
    def _masked_min():
        # Broadcast-compare mask (no full (tm,tn) int32 iotas): exclude the
        # positive pair (the diagonal) from the negative min.
        row_ids = lax.broadcasted_iota(jnp.int32, (tm, 1), 0) + row0   # (tm,1)
        part = minm_ref[...]
        for s in range(n_slabs):
            col_ids = (lax.broadcasted_iota(jnp.int32, (1, 128), 1)
                       + (col0 + s * 128))                             # (1,128)
            slab = jnp.where(col_ids == row_ids, jnp.inf,
                             m[:, s * 128:(s + 1) * 128])
            part = jnp.minimum(part, slab)
        minm_ref[...] = part

    @pl.when(j == n_col_blocks - 1)
    def _finalize():
        # One cross-lane reduction + one sqrt per row block (not per (i,j)).
        minr = jnp.min(minm_ref[...], axis=1, keepdims=True)          # (tm, 1)
        min_lane = jnp.transpose(minr)                                 # (1, tm)
        dist_an = jnp.sqrt(jnp.maximum(x2_ref[0] + min_lane, eps))    # (1, tm)
        o_ref[0] = jnp.maximum(ap_ref[0] - dist_an + margin, 0.0)     # (1, tm)


def batch_hard_negative_loss(anchor_features, positive_features, margin=MARGIN):
    x = anchor_features
    y = positive_features
    assert x.shape == y.shape and x.ndim == 2
    n, d = x.shape
    assert n >= 2, "need at least one negative per anchor"
    in_dtype = x.dtype

    # --- O(N*D) wrapper-side prep (cheap XLA ops, keeps the kernel body lean).
    xf = x.astype(jnp.float32)
    yf = y.astype(jnp.float32)
    x2 = jnp.sum(xf * xf, axis=1)                                   # (n,)
    y2 = jnp.sum(yf * yf, axis=1)                                   # (n,)
    xy_diag = jnp.sum(xf * yf, axis=1)                              # (n,)
    dist_ap = jnp.sqrt(jnp.maximum(x2 + y2 - 2.0 * xy_diag, EPS))   # (n,)

    # --- Tile selection.
    # Small N: one row block.  Moderate N: >= 2 row blocks so both v7x
    # TensorCores run ("parallel" row axis).  Large N: tm = 128.
    if n <= 64:
        tm = _round_up(n, 8)
    elif n <= 256:
        tm = _round_up(-(-n // 2), 8)
    else:
        tm = 128
    tn = min(2048, _round_up(n, 128))
    n_pad_r = _round_up(n, tm)
    n_pad_c = _round_up(n, tn)
    r_blocks = n_pad_r // tm
    c_blocks = n_pad_c // tn

    # --- Augmented MXU operands (kept in the input dtype; f32 accumulate).
    ones_col = jnp.ones((n, 1), dtype=in_dtype)
    x_aug = jnp.concatenate([x, ones_col], axis=1)                  # (n, d+1)
    y_aug = jnp.concatenate(
        [y * jnp.asarray(-2.0, in_dtype), y2[:, None].astype(in_dtype)],
        axis=1)                                                     # (n, d+1)

    if n_pad_r != n:
        x_aug = jnp.pad(x_aug, ((0, n_pad_r - n), (0, 0)))
    if n_pad_c != n:
        # Poison padded columns via the |y|^2 slot so no pad mask is needed.
        pad_rows = jnp.zeros((n_pad_c - n, d + 1), dtype=in_dtype)
        pad_rows = pad_rows.at[:, d].set(jnp.asarray(POISON, in_dtype))
        y_aug = jnp.concatenate([y_aug, pad_rows], axis=0)

    def _to_blocks(v):  # (n,) f32 -> (r_blocks, 1, tm) lane-dense slabs
        v = jnp.pad(v.astype(jnp.float32), (0, n_pad_r - n))
        return v.reshape(r_blocks, 1, tm)

    ap_blk = _to_blocks(dist_ap)
    x2_blk = _to_blocks(x2)

    kernel = functools.partial(_bhn_kernel, margin=float(margin), eps=EPS,
                               tm=tm, tn=tn)

    hinge = pl.pallas_call(
        kernel,
        out_shape=jax.ShapeDtypeStruct((r_blocks, 1, tm), jnp.float32),
        grid_spec=pltpu.PrefetchScalarGridSpec(
            num_scalar_prefetch=0,
            grid=(r_blocks, c_blocks),
            in_specs=[
                pl.BlockSpec((tm, d + 1), lambda i, j: (i, 0)),   # x_aug (resident over j)
                pl.BlockSpec((tn, d + 1), lambda i, j: (j, 0)),   # y_aug (streams over j)
                pl.BlockSpec((1, 1, tm), lambda i, j: (i, 0, 0)),  # dist_ap slab
                pl.BlockSpec((1, 1, tm), lambda i, j: (i, 0, 0)),  # |x|^2 slab
            ],
            out_specs=pl.BlockSpec((1, 1, tm), lambda i, j: (i, 0, 0)),
            scratch_shapes=[
                pltpu.VMEM((tm, 128), jnp.float32),  # lane-group running min
            ],
        ),
        compiler_params=pltpu.CompilerParams(
            dimension_semantics=("parallel", "arbitrary")),
    )(x_aug, y_aug, ap_blk, x2_blk)

    per_row = hinge.reshape(-1)[:n]
    return jnp.sum(per_row) / jnp.float32(n)


def _reference_loss(x, y, margin=MARGIN, eps=EPS):
    # Pure-JAX reference for validation (mirrors the PyTorch module).
    x = x.astype(jnp.float32)
    y = y.astype(jnp.float32)
    x2 = jnp.sum(x * x, axis=1, keepdims=True)
    y2 = jnp.sum(y * y, axis=1, keepdims=True)
    d2 = jnp.maximum(x2 + y2.T - 2.0 * x @ y.T, eps)
    dist = jnp.sqrt(d2)
    n = dist.shape[0]
    dist_ap = jnp.diagonal(dist)
    eye = jnp.eye(n, dtype=bool)
    dist_an = jnp.min(jnp.where(eye, jnp.inf, dist), axis=1)
    return jnp.mean(jnp.maximum(dist_ap - dist_an + margin, 0.0))


if __name__ == "__main__":
    key = jax.random.PRNGKey(0)
    k1, k2, k3, k4, k5, k6 = jax.random.split(key, 6)

    # Small case (single block, matches the module's expected feature shapes).
    N, D = 8, 32
    anchor = jax.random.normal(k1, (N, D), dtype=jnp.float32)
    positive = jax.random.normal(k2, (N, D), dtype=jnp.float32)
    loss = batch_hard_negative_loss(anchor, positive)
    jax.block_until_ready(loss)
    ref = _reference_loss(anchor, positive)
    assert jnp.allclose(loss, ref, rtol=1e-4, atol=1e-4), (loss, ref)

    # Moderate case exercising the 2-row-block (megacore) path with tm !| tn.
    N1, D1 = 200, 32
    anchor1 = jax.random.normal(k3, (N1, D1), dtype=jnp.float32)
    positive1 = jax.random.normal(k4, (N1, D1), dtype=jnp.float32)
    loss1 = batch_hard_negative_loss(anchor1, positive1)
    jax.block_until_ready(loss1)
    ref1 = _reference_loss(anchor1, positive1)
    assert jnp.allclose(loss1, ref1, rtol=1e-4, atol=1e-4), (loss1, ref1)

    # Larger case exercising multiple row blocks, padding, poisoned columns,
    # and the lane-group running-min / deferred cross-lane reduction.
    N2, D2 = 600, 32
    anchor2 = jax.random.normal(k5, (N2, D2), dtype=jnp.float32)
    positive2 = jax.random.normal(k6, (N2, D2), dtype=jnp.float32)
    loss2 = batch_hard_negative_loss(anchor2, positive2)
    jax.block_until_ready(loss2)
    ref2 = _reference_loss(anchor2, positive2)
    assert jnp.allclose(loss2, ref2, rtol=1e-4, atol=1e-4), (loss2, ref2)

    print("KERNEL_OK")
</pallas_src>

<mosaic_0001>
module attributes {stable_mosaic.version = 11 : i64} {
  func.func @_bhn_kernel(%arg0: i32, %arg1: i32, %arg2: memref<8x33xf32, #tpu.memory_space<vmem>>, %arg3: memref<128x33xf32, #tpu.memory_space<vmem>>, %arg4: memref<1x1x8xf32, #tpu.memory_space<vmem>>, %arg5: memref<1x1x8xf32, #tpu.memory_space<vmem>>, %arg6: memref<1x1x8xf32, #tpu.memory_space<vmem>>, %arg7: memref<8x128xf32, #tpu.memory_space<vmem>>) attributes {dimension_semantics = [#tpu.dimension_semantics<parallel>, #tpu.dimension_semantics<arbitrary>], iteration_bounds = array<i64: 1, 1>, scalar_prefetch = 0 : i64, scratch_operands = 1 : i64, tpu.core_type = #tpu.core_type<tc>, window_params = [{transform_indices = @transform_0, window_bounds = array<i64: 8, 33>}, {transform_indices = @transform_1, window_bounds = array<i64: 128, 33>}, {transform_indices = @transform_2, window_bounds = array<i64: 1, 1, 8>}, {transform_indices = @transform_3, window_bounds = array<i64: 1, 1, 8>}, {transform_indices = @transform_4, window_bounds = array<i64: 1, 1, 8>}]} {
    %c0 = arith.constant 0 : index
    %c0_0 = arith.constant 0 : index
    %0 = vector.load %arg2[%c0, %c0_0] : memref<8x33xf32, #tpu.memory_space<vmem>>, vector<8x33xf32>
    %c0_1 = arith.constant 0 : index
    %c0_2 = arith.constant 0 : index
    %1 = vector.load %arg3[%c0_1, %c0_2] : memref<128x33xf32, #tpu.memory_space<vmem>>, vector<128x33xf32>
    %cst = arith.constant dense<0.000000e+00> : vector<8x128xf32>
    %2 = tpu.matmul %0, %1, %cst {dimension_numbers = #tpu.dot_dimension_numbers<[1], [1], [0], [0], [0, 0, 1, 0], [], []>} : vector<8x33xf32>, vector<128x33xf32>, vector<8x128xf32> -> vector<8x128xf32>
    %c0_i32 = arith.constant 0 : i32
    %3 = arith.cmpi eq, %arg1, %c0_i32 : i32
    %4 = arith.extui %3 : i1 to i32
    %c0_i32_3 = arith.constant 0 : i32
    %5 = arith.cmpi ne, %4, %c0_i32_3 : i32
    scf.if %5 {
      %cst_10 = arith.constant 0x7F800000 : f32
      %21 = vector.broadcast %cst_10 : f32 to vector<8x128xf32>
      %c0_11 = arith.constant 0 : index
      %c0_12 = arith.constant 0 : index
      %22 = vector.load %arg7[%c0_11, %c0_12] : memref<8x128xf32, #tpu.memory_space<vmem>>, vector<8x128xf32>
      tpu.vector_store %arg7[%c0_11, %c0_12], %21 {strides = array<i32>} : memref<8x128xf32, #tpu.memory_space<vmem>>, vector<8x128xf32>,
    } else {
    }
    %c8_i32 = arith.constant 8 : i32
    %6 = arith.muli %arg0, %c8_i32 : i32
    %c128_i32 = arith.constant 128 : i32
    %7 = arith.muli %arg1, %c128_i32 : i32
    %c128_i32_4 = arith.constant 128 : i32
    %8 = arith.addi %7, %c128_i32_4 : i32
    %9 = arith.cmpi slt, %6, %8 : i32
    %c8_i32_5 = arith.constant 8 : i32
    %10 = arith.addi %6, %c8_i32_5 : i32
    %11 = arith.cmpi slt, %7, %10 : i32
    %12 = arith.andi %9, %11 : i1
    %true = arith.constant true
    %13 = arith.xori %12, %true : i1
    %14 = arith.extui %13 : i1 to i32
    %c0_i32_6 = arith.constant 0 : i32
    %15 = arith.cmpi ne, %14, %c0_i32_6 : i32
    scf.if %15 {
      %c0_10 = arith.constant 0 : index
      %c0_11 = arith.constant 0 : index
      %21 = vector.load %arg7[%c0_10, %c0_11] : memref<8x128xf32, #tpu.memory_space<vmem>>, vector<8x128xf32>
      %22 = arith.minimumf %21, %2 : vector<8x128xf32>
      %c0_12 = arith.constant 0 : index
      %c0_13 = arith.constant 0 : index
      %23 = vector.load %arg7[%c0_12, %c0_13] : memref<8x128xf32, #tpu.memory_space<vmem>>, vector<8x128xf32>
      tpu.vector_store %arg7[%c0_12, %c0_13], %22 {strides = array<i32>} : memref<8x128xf32, #tpu.memory_space<vmem>>, vector<8x128xf32>,
    } else {
    }
    %16 = arith.extui %12 : i1 to i32
    %c0_i32_7 = arith.constant 0 : i32
    %17 = arith.cmpi ne, %16, %c0_i32_7 : i32
    scf.if %17 {
      %21 = tpu.iota {dimensions = array<i32: 0>} : vector<8x1xi32>
      %22 = vector.broadcast %6 : i32 to vector<8x1xi32>
      %23 = arith.addi %21, %22 : vector<8x1xi32>
      %c0_10 = arith.constant 0 : index
      %c0_11 = arith.constant 0 : index
      %24 = vector.load %arg7[%c0_10, %c0_11] : memref<8x128xf32, #tpu.memory_space<vmem>>, vector<8x128xf32>
      %25 = tpu.iota {dimensions = array<i32: 1>} : vector<1x128xi32>
      %c0_i32_12 = arith.constant 0 : i32
      %26 = arith.addi %7, %c0_i32_12 : i32
      %27 = vector.broadcast %26 : i32 to vector<1x128xi32>
      %28 = arith.addi %25, %27 : vector<1x128xi32>
      %29 = vector.broadcast %28 : vector<1x128xi32> to vector<8x128xi32>
      %30 = vector.broadcast %23 : vector<8x1xi32> to vector<8x128xi32>
      %31 = arith.cmpi eq, %29, %30 : vector<8x128xi32>
      %cst_13 = arith.constant 0x7F800000 : f32
      %32 = vector.broadcast %cst_13 : f32 to vector<8x128xf32>
      %33 = arith.select %31, %32, %2 : vector<8x128xi1>, vector<8x128xf32>
      %34 = arith.minimumf %24, %33 : vector<8x128xf32>
      %c0_14 = arith.constant 0 : index
      %c0_15 = arith.constant 0 : index
      %35 = vector.load %arg7[%c0_14, %c0_15] : memref<8x128xf32, #tpu.memory_space<vmem>>, vector<8x128xf32>
      tpu.vector_store %arg7[%c0_14, %c0_15], %34 {strides = array<i32>} : memref<8x128xf32, #tpu.memory_space<vmem>>, vector<8x128xf32>,
    } else {
    }
    %c0_i32_8 = arith.constant 0 : i32
    %18 = arith.cmpi eq, %arg1, %c0_i32_8 : i32
    %19 = arith.extui %18 : i1 to i32
    %c0_i32_9 = arith.constant 0 : i32
    %20 = arith.cmpi ne, %19, %c0_i32_9 : i32
    scf.if %20 {
      %c0_10 = arith.constant 0 : index
      %c0_11 = arith.constant 0 : index
      %21 = vector.load %arg7[%c0_10, %c0_11] : memref<8x128xf32, #tpu.memory_space<vmem>>, vector<8x128xf32>
      %cst_12 = arith.constant dense<0x7F800000> : vector<8xf32>
      %22 = vector.multi_reduction <minimumf>, %21, %cst_12 [1] : vector<8x128xf32> to vector<8xf32>
      %23 = vector.shape_cast %22 : vector<8xf32> to vector<8x1xf32>
      %24 = tpu.transpose %23, [1, 0] : vector<8x1xf32> -> vector<1x8xf32>
      %c0_13 = arith.constant 0 : index
      %c0_14 = arith.constant 0 : index
      %c0_15 = arith.constant 0 : index
      %25 = vector.load %arg5[%c0_13, %c0_14, %c0_15] : memref<1x1x8xf32, #tpu.memory_space<vmem>>, vector<1x1x8xf32>
      %26 = vector.shape_cast %25 : vector<1x1x8xf32> to vector<1x8xf32>
      %27 = arith.addf %26, %24 : vector<1x8xf32>
      %cst_16 = arith.constant 9.99999997E-7 : f32
      %28 = vector.broadcast %cst_16 : f32 to vector<1x8xf32>
      %29 = arith.maximumf %27, %28 : vector<1x8xf32>
      %30 = math.sqrt %29 : vector<1x8xf32>
      %c0_17 = arith.constant 0 : index
      %c0_18 = arith.constant 0 : index
      %c0_19 = arith.constant 0 : index
      %31 = vector.load %arg4[%c0_17, %c0_18, %c0_19] : memref<1x1x8xf32, #tpu.memory_space<vmem>>, vector<1x1x8xf32>
      %32 = vector.shape_cast %31 : vector<1x1x8xf32> to vector<1x8xf32>
      %33 = arith.subf %32, %30 : vector<1x8xf32>
      %cst_20 = arith.constant 1.000000e+00 : f32
      %34 = vector.broadcast %cst_20 : f32 to vector<1x8xf32>
      %35 = arith.addf %33, %34 : vector<1x8xf32>
      %cst_21 = arith.constant 0.000000e+00 : f32
      %36 = vector.broadcast %cst_21 : f32 to vector<1x8xf32>
      %37 = arith.maximumf %35, %36 : vector<1x8xf32>
      %c0_22 = arith.constant 0 : index
      %c0_23 = arith.constant 0 : index
      %c0_24 = arith.constant 0 : index
      %38 = vector.load %arg6[%c0_22, %c0_23, %c0_24] : memref<1x1x8xf32, #tpu.memory_space<vmem>>, vector<1x1x8xf32>
      %39 = vector.shape_cast %38 : vector<1x1x8xf32> to vector<1x8xf32>
      %40 = vector.shape_cast %37 : vector<1x8xf32> to vector<1x1x8xf32>
      tpu.vector_store %arg6[%c0_22, %c0_23, %c0_24], %40 {strides = array<i32>} : memref<1x1x8xf32, #tpu.memory_space<vmem>>, vector<1x1x8xf32>,
    } else {
    }
    return
  }
  func.func @transform_0(%arg0: i32, %arg1: i32) -> (i32, i32) {
    %c0_i32 = arith.constant 0 : i32
    %c0_i32_0 = arith.constant 0 : i32
    return %arg0, %c0_i32 : i32, i32
  }
  func.func @transform_1(%arg0: i32, %arg1: i32) -> (i32, i32) {
    %c0_i32 = arith.constant 0 : i32
    %c0_i32_0 = arith.constant 0 : i32
    return %arg1, %c0_i32 : i32, i32
  }
  func.func @transform_2(%arg0: i32, %arg1: i32) -> (i32, i32, i32) {
    %c0_i32 = arith.constant 0 : i32
    %c0_i32_0 = arith.constant 0 : i32
    %c0_i32_1 = arith.constant 0 : i32
    return %arg0, %c0_i32, %c0_i32_0 : i32, i32, i32
  }
  func.func @transform_3(%arg0: i32, %arg1: i32) -> (i32, i32, i32) {
    %c0_i32 = arith.constant 0 : i32
    %c0_i32_0 = arith.constant 0 : i32
    %c0_i32_1 = arith.constant 0 : i32
    return %arg0, %c0_i32, %c0_i32_0 : i32, i32, i32
  }
  func.func @transform_4(%arg0: i32, %arg1: i32) -> (i32, i32, i32) {
    %c0_i32 = arith.constant 0 : i32
    %c0_i32_0 = arith.constant 0 : i32
    %c0_i32_1 = arith.constant 0 : i32
    return %arg0, %c0_i32, %c0_i32_0 : i32, i32, i32
  }
}

</mosaic_0001>

<bundles_post_ra>
// kernel: tpu_custom_call.1
= control target key start
LH: loop header
LB: loop body
LE: loop exit
PB: predicated region body
PF: predicated region fallthrough
CT: control target
= control target key end

     0   :  { %vm35_vm0 = vcmask 269312   ;;  %s366_s0 = inlined_call_operand.vmem [shape: f32[8,33], index: 0, kind: input, shape index: {}]   ;;  %s367_s1 = inlined_call_operand.vmem [shape: f32[128,33], index: 1, kind: input, shape index: {}]   ;;  %s368_s2 = inlined_call_operand.vmem [shape: f32[1,1,8], index: 2, kind: input, shape index: {}]   ;;  %s369_s3 = inlined_call_operand.vmem [shape: f32[1,1,8], index: 3, kind: input, shape index: {}]   ;;  %s370_s4 = inlined_call_operand.hbm [shape: f32[1,1,8], index: 4, kind: output, shape index: {}]  }
   0x1   :  { %v34_v0 = vld [vmem:[%s367_s1 + $0x78] sm:$0xff]  ;;  %v33_v1 = vld [vmem:[%s367_s1 + $0x70] sm:$0xff] }
   0x2   :  { %216 = vmatpush.xpose.msk.msra.mxu0 %vm35_vm0, %v34_v0 }
   0x3   :  { %9 = vsyncpa [#allocation4], 0  ;;  %v32_v2 = vld [vmem:[%s367_s1 + $0x68] sm:$0xff]  ;;  %v31_v3 = vld [vmem:[%s367_s1 + $0x60] sm:$0xff]  ;;  %v122_v17 = vlaneseq  ;;  %s207_s28 = sshll.u32 %s370_s4, 4  ;;  %vm198_vm4 = vcmask 57344   ;;  %s208_s28 = int_to_ptr.hbm [resolvable:$true] %s207_s28 }
   0x4   :  { %v30_v4 = vld [vmem:[%s367_s1 + $0x58] sm:$0xff]  ;;  %v29_v5 = vld [vmem:[%s367_s1 + $0x50] sm:$0xff]  ;;  %v28_v6 = vld [vmem:[%s367_s1 + $0x48] sm:$0xff] }
   0x5   :  { %v27_v7 = vld [vmem:[%s367_s1 + $0x40] sm:$0xff]  ;;  %v26_v8 = vld [vmem:[%s367_s1 + $0x38] sm:$0xff]  ;;  %v25_v9 = vld [vmem:[%s367_s1 + $0x30] sm:$0xff]  ;;  %v123_v18 = vshrl.u32 %v122_v17, 7  ;;  %v128_v19 = vand.u32 127, %v122_v17 }
   0x6   :  { %217 = vmatpush.xpose.msk.msra.mxu0 %vm35_vm0, %v33_v1  ;;  %v24_v10 = vld [vmem:[%s367_s1 + $0x28] sm:$0xff]  ;;  %v23_v11 = vld [vmem:[%s367_s1 + $0x20] sm:$0xff]  ;;  %v22_v12 = vld [vmem:[%s367_s1 + $0x18] sm:$0xff] }
   0x7   :  { %v21_v13 = vld [vmem:[%s367_s1 + $0x10] sm:$0xff]  ;;  %v20_v14 = vld [vmem:[%s367_s1 + $0x8] sm:$0xff]  ;;  %v19_v15 = vld [vmem:[%s367_s1] sm:$0xff]  ;;  %vm131_vm1 = vcmp.eq.s32.totalorder %v128_v19, %v123_v18 }
   0x8   :  { %v18_v16 = vld [vmem:[%s366_s0] sm:$0xff] }
   0x9   :  { %v179_v23 = vld [vmem:[%s369_s3] sm:$0x1]  ;;  %s263_s3 = smov [#allocation3]  }
   0xa   :  { %218 = vmatpush.xpose.msk.msra.mxu0 %vm35_vm0, %v32_v2  ;;  %v194_v35 = vld [vmem:[%s368_s2] sm:$0x1]  ;;  %s205_s25 = sshll.u32 %s263_s3, 4  ;;  %s206_s25 = int_to_ptr.vmem [resolvable:$true] %s205_s25 }
   0xe   :  { %219 = vmatpush.xpose.msk.msra.mxu0 %vm35_vm0, %v31_v3 }
  0x12   :  { %220 = vmatpush.xpose.msk.msra.mxu0 %vm35_vm0, %v30_v4 }
  0x16   :  { %221 = vmatpush.xpose.msk.msra.mxu0 %vm35_vm0, %v29_v5 }
  0x1a   :  { %222 = vmatpush.xpose.msk.msra.mxu0 %vm35_vm0, %v28_v6 }
  0x1e   :  { %223 = vmatpush.xpose.msk.msra.mxu0 %vm35_vm0, %v27_v7 }
  0x22   :  { %224 = vmatpush.xpose.msk.msra.mxu0 %vm35_vm0, %v26_v8 }
  0x26   :  { %225 = vmatpush.xpose.msk.msra.mxu0 %vm35_vm0, %v25_v9 }
  0x2a   :  { %226 = vmatpush.xpose.msk.msra.mxu0 %vm35_vm0, %v24_v10 }
  0x2e   :  { %227 = vmatpush.xpose.msk.msra.mxu0 %vm35_vm0, %v23_v11 }
  0x32   :  { %228 = vmatpush.xpose.msk.msra.mxu0 %vm35_vm0, %v22_v12 }
  0x36   :  { %229 = vmatpush.xpose.msk.msra.mxu0 %vm35_vm0, %v21_v13 }
  0x3a   :  { %230 = vmatpush.xpose.msk.msra.mxu0 %vm35_vm0, %v20_v14 }
  0x3e   :  { %231 = vmatpush.xpose.msk.msra.mxu0 %vm35_vm0, %v19_v15 }
  0x41   :  { %232 = vmatmul.msk.f32.vlgmr.msra.gmra.mxu0 %vm35_vm0, %v18_v16 }
  0xbe   :  { %v104_v20 = vpop.f32.mrf.mxu0 }
  0xbf   :  { %v132_v21 = vsel %vm131_vm1, inf, %v104_v20 }
  0xc0   :  { %145 = vmin.xlane.f32.xlu0 %v132_v21 }
 0x133   :  { %v146_v22 = vpop.xlane.xlu0 %145 }
 0x134   :  { %147 = vxpose.xlu0.b32.start.end [1/1] (short) (narrow) %v146_v22, 8 }
 0x1d8   :  { %v163_v24 = vpop.trf.xlu0 }
 0x1d9   :  { %v180_v25 = vadd.f32 %v179_v23, %v163_v24 }
 0x1db   :  { %v181_v26 = vmax.f32 %v180_v25, 1e-06 }
 0x1dd   :  { %235 = vrsqrt.f32 %v181_v26  ;;  %vm189_vm2 = vcmp.eq.f32.partialorder %v181_v26, inf  ;;  %v192_v34 = vand.u32 2147483648, %v181_v26  ;;  %vm191_vm3 = vcmp.eq.f32.partialorder %v181_v26, 0.0 }
 0x1e3   :  { %v236_v27 = vpop.eup %235 }
 0x1e4   :  { %v183_v28 = vmul.f32 %v236_v27, %v181_v26 }
 0x1e6   :  { %v184_v29 = vmul.f32 %v236_v27, %v183_v28 }
 0x1e8   :  { %v185_v30 = vmul.f32 0.5, %v184_v29 }
 0x1ea   :  { %v186_v31 = vsub.f32 1.5, %v185_v30 }
 0x1ec   :  { %v187_v32 = vmul.f32 %v236_v27, %v186_v31 }
 0x1ee   :  { %v188_v33 = vmul.f32 %v187_v32, %v181_v26 }
 0x1f0   :  { %v190_v36 = vsel %vm189_vm2, %v181_v26, %v188_v33 }
 0x1f1   :  { %v193_v37 = vsel %vm191_vm3, %v192_v34, %v190_v36 }
 0x1f2   :  { %v195_v38 = vsub.f32 %v194_v35, %v193_v37 }
 0x1f4   :  { %v196_v39 = vadd.f32 1.0, %v195_v38 }
 0x1f6   :  { %v197_v40 = vmax.f32 %v196_v39, 0.0 }
 0x1f8   :  { %199 = vst.msk [vmem:[#allocation3] sm:$0x1] %vm198_vm4, %v197_v40 }
 0x1f9   :  { %210 = dma.vmem_to_hbm [thread:$0]  %s206_s25, 16, %s208_s28, [#allocation4]  }
 0x1fa   :  { %261 = dma.done.wait [#allocation4], 16  }
 0x1fb   :  { %262 = vsyncadd [#allocation4], 4294967280 }
 0x1fc   :  { %215 = vsyncpa [#allocation4], 1 }

</bundles_post_ra>
